<compile_context>
chip_gen: v5e
topology: v5e:2x2
jax: 0.10.0
libtpu: 0.0.40
codegen_flags: <defaults>
</compile_context>

<pallas_src>
import functools

import jax
import jax.numpy as jnp
import numpy as np
from jax import lax
from jax.experimental import pallas as pl
from jax.experimental.pallas import tpu as pltpu


def _band_matrices(w, W):
    """Build banded per-row tap matrices from a (3, 3, C_in, C_out) HWIO kernel.

    Returns band of shape (3, W*C_in, W*C_out) with
      band[ky, xp*C_in + ci, x*C_out + co] = w[ky, xp - x + 1, ci, co]  if 0 <= xp-x+1 < 3
                                            0                           otherwise,
    which folds both the x-direction taps and the x zero-padding into the matmul K dim.
    """
    C_in, C_out = w.shape[2], w.shape[3]
    xp = jnp.arange(W)[:, None]   # source pixel column
    x = jnp.arange(W)[None, :]    # output pixel column
    ind = xp - x + 1              # (W, W); valid taps are 0, 1, 2
    onehot = (ind[None, :, :] == jnp.arange(3)[:, None, None]).astype(w.dtype)  # (kx, xp, x)
    band = jnp.einsum('kpx,ykcd->ypcxd', onehot, w)   # (ky, xp, ci, x, co)
    return band.reshape(3, W * C_in, W * C_out)


def _gated_conv_kernel(x_ref, m_ref, bwx_ref, bwm_ref, bx_ref, bm_ref, o_ref,
                       xpad_ref, mpad_ref, *, H, WC_in, WC_out, compute_dtype):
    # x_ref / m_ref   : (1, H, W*C_in)   flat-row image / mask tile (one batch element)
    # bwx_ref/bwm_ref : (3, W*C_in, W*C_out) banded tap matrices (one per ky)
    # bx_ref / bm_ref : (1, W*C_out)     biases tiled across W
    # o_ref           : (1, H, W*C_out)
    # xpad_ref/mpad_ref: (H+16, W*C_in)  VMEM scratch, data at rows [8, 8+H), zero halo
    #                    rows at 7 and 8+H (fused zero padding in y).
    x = x_ref[0]            # original precision, also used for the residual add
    m = m_ref[0]

    zero_band = jnp.zeros((8, WC_in), x.dtype)
    # Zero halo bands (aligned 8-row stores); row 7 is the y-1 halo, row 8+H the y+1 halo.
    xpad_ref[0:8, :] = zero_band
    xpad_ref[8 + H:16 + H, :] = zero_band
    mpad_ref[0:8, :] = zero_band
    mpad_ref[8 + H:16 + H, :] = zero_band
    # Interior copy at an 8-aligned sublane offset.
    xpad_ref[8:8 + H, :] = x
    mpad_ref[8:8 + H, :] = m

    acc_x = jnp.zeros((H, WC_out), jnp.float32)
    acc_m = jnp.zeros((H, WC_out), jnp.float32)
    # 3 matmuls per conv (one per ky), K = W*C_in, f32 accumulation on the MXU.
    for ky in range(3):
        xwin = xpad_ref[7 + ky:7 + ky + H, :].astype(compute_dtype)
        mwin = mpad_ref[7 + ky:7 + ky + H, :].astype(compute_dtype)
        acc_x = acc_x + jnp.dot(xwin, bwx_ref[ky], preferred_element_type=jnp.float32)
        acc_m = acc_m + jnp.dot(mwin, bwm_ref[ky], preferred_element_type=jnp.float32)

    conv_x = acc_x + bx_ref[...]                     # (1, W*C_out) broadcasts over rows
    gate = jax.nn.sigmoid(acc_m + bm_ref[...])
    # Residual from the original-precision tile (not the compute_dtype copy).
    o_ref[0] = (conv_x * gate + x.astype(jnp.float32)).astype(o_ref.dtype)


def gated_conv_pallas(x_nhwc, mask_nhwc, wx, bx, wm, bm, *, compute_dtype=jnp.float32):
    """x_nhwc, mask_nhwc: (N, H, W, C_in). wx/wm: (3, 3, C_in, C_out) HWIO. bx/bm: (C_out,)."""
    N, H, W, C_in = x_nhwc.shape
    C_out = wx.shape[-1]
    assert C_in == C_out, "residual add requires in_channels == out_channels"
    WC_in, WC_out = W * C_in, W * C_out

    # Free reshapes of contiguous NHWC -> lane-dense flat rows (no transpose, no pad pass).
    x_flat = x_nhwc.reshape(N, H, WC_in)
    m_flat = mask_nhwc.reshape(N, H, WC_in)

    band_x = _band_matrices(wx, W).astype(compute_dtype)   # (3, WC_in, WC_out)
    band_m = _band_matrices(wm, W).astype(compute_dtype)
    bx_t = jnp.tile(bx, W).reshape(1, WC_out).astype(jnp.float32)
    bm_t = jnp.tile(bm, W).reshape(1, WC_out).astype(jnp.float32)

    kernel = functools.partial(_gated_conv_kernel, H=H, WC_in=WC_in, WC_out=WC_out,
                               compute_dtype=compute_dtype)

    out_flat = pl.pallas_call(
        kernel,
        out_shape=jax.ShapeDtypeStruct((N, H, WC_out), x_nhwc.dtype),
        grid_spec=pltpu.PrefetchScalarGridSpec(
            num_scalar_prefetch=0,
            grid=(N,),
            in_specs=[
                pl.BlockSpec((1, H, WC_in), lambda n: (n, 0, 0)),
                pl.BlockSpec((1, H, WC_in), lambda n: (n, 0, 0)),
                pl.BlockSpec((3, WC_in, WC_out), lambda n: (0, 0, 0)),
                pl.BlockSpec((3, WC_in, WC_out), lambda n: (0, 0, 0)),
                pl.BlockSpec((1, WC_out), lambda n: (0, 0)),
                pl.BlockSpec((1, WC_out), lambda n: (0, 0)),
            ],
            out_specs=pl.BlockSpec((1, H, WC_out), lambda n: (n, 0, 0)),
            scratch_shapes=[
                pltpu.VMEM((H + 16, WC_in), x_nhwc.dtype),   # zero-haloed x rows
                pltpu.VMEM((H + 16, WC_in), x_nhwc.dtype),   # zero-haloed mask rows
            ],
        ),
        compiler_params=pltpu.CompilerParams(dimension_semantics=("parallel",)),
    )(x_flat, m_flat, band_x, band_m, bx_t, bm_t)

    return out_flat.reshape(N, H, W, C_out)


def gated_conv_reference(x_nhwc, mask_nhwc, wx, bx, wm, bm):
    """Pure-JAX reference (matches the PyTorch forward, NHWC layout)."""
    dn = lax.conv_dimension_numbers(x_nhwc.shape, wx.shape, ('NHWC', 'HWIO', 'NHWC'))

    def conv(inp, w, b):
        y = lax.conv_general_dilated(inp, w, window_strides=(1, 1),
                                     padding=((1, 1), (1, 1)), dimension_numbers=dn)
        return y + b[None, None, None, :]

    conv_out = conv(x_nhwc, wx, bx)
    gate = jax.nn.sigmoid(conv(mask_nhwc, wm, bm))
    return conv_out * gate + x_nhwc


if __name__ == "__main__":
    key = jax.random.PRNGKey(0)
    N, C, H, W = 2, 4, 16, 16   # in_channels == out_channels (required by the residual add)

    k_x, k_m, k_wx, k_bx, k_wm, k_bm = jax.random.split(key, 6)
    x = jax.random.normal(k_x, (N, H, W, C), jnp.float32)
    mask = jax.random.normal(k_m, (N, H, W, C), jnp.float32)

    # Conv2d-like init; weights in HWIO = (3, 3, C_in, C_out)
    fan_in = C * 3 * 3
    bound = 1.0 / np.sqrt(fan_in)
    wx = jax.random.uniform(k_wx, (3, 3, C, C), jnp.float32, -bound, bound)
    bx = jax.random.uniform(k_bx, (C,), jnp.float32, -bound, bound)
    wm = jax.random.uniform(k_wm, (3, 3, C, C), jnp.float32, -bound, bound)
    bm = jax.random.uniform(k_bm, (C,), jnp.float32, -bound, bound)

    ref = gated_conv_reference(x, mask, wx, bx, wm, bm)

    # f32 MXU path (matches the PyTorch/reference precision)
    out = jax.block_until_ready(gated_conv_pallas(x, mask, wx, bx, wm, bm))
    np.testing.assert_allclose(np.asarray(out), np.asarray(ref), rtol=2e-4, atol=2e-4)

    # bf16 MXU path (f32 accumulation, original-precision residual) — looser tolerance
    out_bf16 = jax.block_until_ready(
        gated_conv_pallas(x, mask, wx, bx, wm, bm, compute_dtype=jnp.bfloat16))
    np.testing.assert_allclose(np.asarray(out_bf16), np.asarray(ref), rtol=5e-2, atol=5e-2)

    print("KERNEL_OK")
</pallas_src>

<mosaic_0001>
module attributes {stable_mosaic.version = 11 : i64} {
  func.func @_gated_conv_kernel(%arg0: i32, %arg1: memref<1x16x64xf32, #tpu.memory_space<vmem>>, %arg2: memref<1x16x64xf32, #tpu.memory_space<vmem>>, %arg3: memref<3x64x64xf32, #tpu.memory_space<vmem>>, %arg4: memref<3x64x64xf32, #tpu.memory_space<vmem>>, %arg5: memref<1x64xf32, #tpu.memory_space<vmem>>, %arg6: memref<1x64xf32, #tpu.memory_space<vmem>>, %arg7: memref<1x16x64xf32, #tpu.memory_space<vmem>>, %arg8: memref<32x64xf32, #tpu.memory_space<vmem>>, %arg9: memref<32x64xf32, #tpu.memory_space<vmem>>) attributes {dimension_semantics = [#tpu.dimension_semantics<parallel>], iteration_bounds = array<i64: 2>, scalar_prefetch = 0 : i64, scratch_operands = 2 : i64, tpu.core_type = #tpu.core_type<tc>, window_params = [{transform_indices = @transform_0, window_bounds = array<i64: 1, 16, 64>}, {transform_indices = @transform_1, window_bounds = array<i64: 1, 16, 64>}, {pipeline_mode = #tpu.pipeline_mode<synchronous>, transform_indices = @transform_2, window_bounds = array<i64: 3, 64, 64>}, {pipeline_mode = #tpu.pipeline_mode<synchronous>, transform_indices = @transform_3, window_bounds = array<i64: 3, 64, 64>}, {pipeline_mode = #tpu.pipeline_mode<synchronous>, transform_indices = @transform_4, window_bounds = array<i64: 1, 64>}, {pipeline_mode = #tpu.pipeline_mode<synchronous>, transform_indices = @transform_5, window_bounds = array<i64: 1, 64>}, {transform_indices = @transform_6, window_bounds = array<i64: 1, 16, 64>}]} {
    %c0 = arith.constant 0 : index
    %c0_0 = arith.constant 0 : index
    %c0_1 = arith.constant 0 : index
    %0 = vector.load %arg1[%c0, %c0_0, %c0_1] : memref<1x16x64xf32, #tpu.memory_space<vmem>>, vector<1x16x64xf32>
    %1 = vector.shape_cast %0 : vector<1x16x64xf32> to vector<16x64xf32>
    %c0_2 = arith.constant 0 : index
    %c0_3 = arith.constant 0 : index
    %c0_4 = arith.constant 0 : index
    %2 = vector.load %arg2[%c0_2, %c0_3, %c0_4] : memref<1x16x64xf32, #tpu.memory_space<vmem>>, vector<1x16x64xf32>
    %3 = vector.shape_cast %2 : vector<1x16x64xf32> to vector<16x64xf32>
    %cst = arith.constant 0.000000e+00 : f32
    %4 = vector.broadcast %cst : f32 to vector<8x64xf32>
    %c0_5 = arith.constant 0 : index
    %c0_6 = arith.constant 0 : index
    %5 = vector.load %arg8[%c0_5, %c0_6] : memref<32x64xf32, #tpu.memory_space<vmem>>, vector<8x64xf32>
    tpu.vector_store %arg8[%c0_5, %c0_6], %4 {strides = array<i32>} : memref<32x64xf32, #tpu.memory_space<vmem>>, vector<8x64xf32>,
    %c24 = arith.constant 24 : index
    %c0_7 = arith.constant 0 : index
    %6 = vector.load %arg8[%c24, %c0_7] : memref<32x64xf32, #tpu.memory_space<vmem>>, vector<8x64xf32>
    tpu.vector_store %arg8[%c24, %c0_7], %4 {strides = array<i32>} : memref<32x64xf32, #tpu.memory_space<vmem>>, vector<8x64xf32>,
    %c0_8 = arith.constant 0 : index
    %c0_9 = arith.constant 0 : index
    %7 = vector.load %arg9[%c0_8, %c0_9] : memref<32x64xf32, #tpu.memory_space<vmem>>, vector<8x64xf32>
    tpu.vector_store %arg9[%c0_8, %c0_9], %4 {strides = array<i32>} : memref<32x64xf32, #tpu.memory_space<vmem>>, vector<8x64xf32>,
    %c24_10 = arith.constant 24 : index
    %c0_11 = arith.constant 0 : index
    %8 = vector.load %arg9[%c24_10, %c0_11] : memref<32x64xf32, #tpu.memory_space<vmem>>, vector<8x64xf32>
    tpu.vector_store %arg9[%c24_10, %c0_11], %4 {strides = array<i32>} : memref<32x64xf32, #tpu.memory_space<vmem>>, vector<8x64xf32>,
    %c8 = arith.constant 8 : index
    %c0_12 = arith.constant 0 : index
    %9 = vector.load %arg8[%c8, %c0_12] : memref<32x64xf32, #tpu.memory_space<vmem>>, vector<16x64xf32>
    tpu.vector_store %arg8[%c8, %c0_12], %1 {strides = array<i32>} : memref<32x64xf32, #tpu.memory_space<vmem>>, vector<16x64xf32>,
    %c8_13 = arith.constant 8 : index
    %c0_14 = arith.constant 0 : index
    %10 = vector.load %arg9[%c8_13, %c0_14] : memref<32x64xf32, #tpu.memory_space<vmem>>, vector<16x64xf32>
    tpu.vector_store %arg9[%c8_13, %c0_14], %3 {strides = array<i32>} : memref<32x64xf32, #tpu.memory_space<vmem>>, vector<16x64xf32>,
    %cst_15 = arith.constant 0.000000e+00 : f32
    %11 = vector.broadcast %cst_15 : f32 to vector<16x64xf32>
    %cst_16 = arith.constant 0.000000e+00 : f32
    %12 = vector.broadcast %cst_16 : f32 to vector<16x64xf32>
    %c7 = arith.constant 7 : index
    %c0_17 = arith.constant 0 : index
    %13 = vector.load %arg8[%c7, %c0_17] : memref<32x64xf32, #tpu.memory_space<vmem>>, vector<16x64xf32>
    %c7_18 = arith.constant 7 : index
    %c0_19 = arith.constant 0 : index
    %14 = vector.load %arg9[%c7_18, %c0_19] : memref<32x64xf32, #tpu.memory_space<vmem>>, vector<16x64xf32>
    %c0_20 = arith.constant 0 : index
    %c0_21 = arith.constant 0 : index
    %c0_22 = arith.constant 0 : index
    %15 = vector.load %arg3[%c0_20, %c0_21, %c0_22] : memref<3x64x64xf32, #tpu.memory_space<vmem>>, vector<1x64x64xf32>
    %16 = vector.shape_cast %15 : vector<1x64x64xf32> to vector<64x64xf32>
    %cst_23 = arith.constant dense<0.000000e+00> : vector<16x64xf32>
    %17 = tpu.matmul %13, %16, %cst_23 {dimension_numbers = #tpu.dot_dimension_numbers<[1], [0], [0], [1], [0, 0, 1, 1], [], []>} : vector<16x64xf32>, vector<64x64xf32>, vector<16x64xf32> -> vector<16x64xf32>
    %18 = arith.addf %11, %17 : vector<16x64xf32>
    %c0_24 = arith.constant 0 : index
    %c0_25 = arith.constant 0 : index
    %c0_26 = arith.constant 0 : index
    %19 = vector.load %arg4[%c0_24, %c0_25, %c0_26] : memref<3x64x64xf32, #tpu.memory_space<vmem>>, vector<1x64x64xf32>
    %20 = vector.shape_cast %19 : vector<1x64x64xf32> to vector<64x64xf32>
    %cst_27 = arith.constant dense<0.000000e+00> : vector<16x64xf32>
    %21 = tpu.matmul %14, %20, %cst_27 {dimension_numbers = #tpu.dot_dimension_numbers<[1], [0], [0], [1], [0, 0, 1, 1], [], []>} : vector<16x64xf32>, vector<64x64xf32>, vector<16x64xf32> -> vector<16x64xf32>
    %22 = arith.addf %12, %21 : vector<16x64xf32>
    %c8_28 = arith.constant 8 : index
    %c0_29 = arith.constant 0 : index
    %23 = vector.load %arg8[%c8_28, %c0_29] : memref<32x64xf32, #tpu.memory_space<vmem>>, vector<16x64xf32>
    %c8_30 = arith.constant 8 : index
    %c0_31 = arith.constant 0 : index
    %24 = vector.load %arg9[%c8_30, %c0_31] : memref<32x64xf32, #tpu.memory_space<vmem>>, vector<16x64xf32>
    %c1 = arith.constant 1 : index
    %c0_32 = arith.constant 0 : index
    %c0_33 = arith.constant 0 : index
    %25 = vector.load %arg3[%c1, %c0_32, %c0_33] : memref<3x64x64xf32, #tpu.memory_space<vmem>>, vector<1x64x64xf32>
    %26 = vector.shape_cast %25 : vector<1x64x64xf32> to vector<64x64xf32>
    %cst_34 = arith.constant dense<0.000000e+00> : vector<16x64xf32>
    %27 = tpu.matmul %23, %26, %cst_34 {dimension_numbers = #tpu.dot_dimension_numbers<[1], [0], [0], [1], [0, 0, 1, 1], [], []>} : vector<16x64xf32>, vector<64x64xf32>, vector<16x64xf32> -> vector<16x64xf32>
    %28 = arith.addf %18, %27 : vector<16x64xf32>
    %c1_35 = arith.constant 1 : index
    %c0_36 = arith.constant 0 : index
    %c0_37 = arith.constant 0 : index
    %29 = vector.load %arg4[%c1_35, %c0_36, %c0_37] : memref<3x64x64xf32, #tpu.memory_space<vmem>>, vector<1x64x64xf32>
    %30 = vector.shape_cast %29 : vector<1x64x64xf32> to vector<64x64xf32>
    %cst_38 = arith.constant dense<0.000000e+00> : vector<16x64xf32>
    %31 = tpu.matmul %24, %30, %cst_38 {dimension_numbers = #tpu.dot_dimension_numbers<[1], [0], [0], [1], [0, 0, 1, 1], [], []>} : vector<16x64xf32>, vector<64x64xf32>, vector<16x64xf32> -> vector<16x64xf32>
    %32 = arith.addf %22, %31 : vector<16x64xf32>
    %c9 = arith.constant 9 : index
    %c0_39 = arith.constant 0 : index
    %33 = vector.load %arg8[%c9, %c0_39] : memref<32x64xf32, #tpu.memory_space<vmem>>, vector<16x64xf32>
    %c9_40 = arith.constant 9 : index
    %c0_41 = arith.constant 0 : index
    %34 = vector.load %arg9[%c9_40, %c0_41] : memref<32x64xf32, #tpu.memory_space<vmem>>, vector<16x64xf32>
    %c2 = arith.constant 2 : index
    %c0_42 = arith.constant 0 : index
    %c0_43 = arith.constant 0 : index
    %35 = vector.load %arg3[%c2, %c0_42, %c0_43] : memref<3x64x64xf32, #tpu.memory_space<vmem>>, vector<1x64x64xf32>
    %36 = vector.shape_cast %35 : vector<1x64x64xf32> to vector<64x64xf32>
    %cst_44 = arith.constant dense<0.000000e+00> : vector<16x64xf32>
    %37 = tpu.matmul %33, %36, %cst_44 {dimension_numbers = #tpu.dot_dimension_numbers<[1], [0], [0], [1], [0, 0, 1, 1], [], []>} : vector<16x64xf32>, vector<64x64xf32>, vector<16x64xf32> -> vector<16x64xf32>
    %38 = arith.addf %28, %37 : vector<16x64xf32>
    %c2_45 = arith.constant 2 : index
    %c0_46 = arith.constant 0 : index
    %c0_47 = arith.constant 0 : index
    %39 = vector.load %arg4[%c2_45, %c0_46, %c0_47] : memref<3x64x64xf32, #tpu.memory_space<vmem>>, vector<1x64x64xf32>
    %40 = vector.shape_cast %39 : vector<1x64x64xf32> to vector<64x64xf32>
    %cst_48 = arith.constant dense<0.000000e+00> : vector<16x64xf32>
    %41 = tpu.matmul %34, %40, %cst_48 {dimension_numbers = #tpu.dot_dimension_numbers<[1], [0], [0], [1], [0, 0, 1, 1], [], []>} : vector<16x64xf32>, vector<64x64xf32>, vector<16x64xf32> -> vector<16x64xf32>
    %42 = arith.addf %32, %41 : vector<16x64xf32>
    %c0_49 = arith.constant 0 : index
    %c0_50 = arith.constant 0 : index
    %43 = vector.load %arg5[%c0_49, %c0_50] : memref<1x64xf32, #tpu.memory_space<vmem>>, vector<1x64xf32>
    %44 = vector.broadcast %43 : vector<1x64xf32> to vector<16x64xf32>
    %45 = arith.addf %38, %44 : vector<16x64xf32>
    %c0_51 = arith.constant 0 : index
    %c0_52 = arith.constant 0 : index
    %46 = vector.load %arg6[%c0_51, %c0_52] : memref<1x64xf32, #tpu.memory_space<vmem>>, vector<1x64xf32>
    %47 = vector.broadcast %46 : vector<1x64xf32> to vector<16x64xf32>
    %48 = arith.addf %42, %47 : vector<16x64xf32>
    %49 = arith.negf %48 : vector<16x64xf32>
    %50 = math.exp %49 : vector<16x64xf32>
    %cst_53 = arith.constant 1.000000e+00 : f32
    %51 = vector.broadcast %cst_53 : f32 to vector<16x64xf32>
    %52 = arith.addf %51, %50 : vector<16x64xf32>
    %53 = arith.divf %51, %52 : vector<16x64xf32>
    %54 = arith.mulf %45, %53 : vector<16x64xf32>
    %55 = arith.addf %54, %1 : vector<16x64xf32>
    %c0_54 = arith.constant 0 : index
    %c0_55 = arith.constant 0 : index
    %c0_56 = arith.constant 0 : index
    %56 = vector.load %arg7[%c0_54, %c0_55, %c0_56] : memref<1x16x64xf32, #tpu.memory_space<vmem>>, vector<1x16x64xf32>
    %57 = vector.shape_cast %56 : vector<1x16x64xf32> to vector<16x64xf32>
    %58 = vector.shape_cast %55 : vector<16x64xf32> to vector<1x16x64xf32>
    tpu.vector_store %arg7[%c0_54, %c0_55, %c0_56], %58 {strides = array<i32>} : memref<1x16x64xf32, #tpu.memory_space<vmem>>, vector<1x16x64xf32>,
    return
  }
  func.func @transform_0(%arg0: i32) -> (i32, i32, i32) {
    %c0_i32 = arith.constant 0 : i32
    %c0_i32_0 = arith.constant 0 : i32
    %c0_i32_1 = arith.constant 0 : i32
    return %arg0, %c0_i32, %c0_i32_0 : i32, i32, i32
  }
  func.func @transform_1(%arg0: i32) -> (i32, i32, i32) {
    %c0_i32 = arith.constant 0 : i32
    %c0_i32_0 = arith.constant 0 : i32
    %c0_i32_1 = arith.constant 0 : i32
    return %arg0, %c0_i32, %c0_i32_0 : i32, i32, i32
  }
  func.func @transform_2(%arg0: i32) -> (i32, i32, i32) {
    %c0_i32 = arith.constant 0 : i32
    %c0_i32_0 = arith.constant 0 : i32
    %c0_i32_1 = arith.constant 0 : i32
    %c0_i32_2 = arith.constant 0 : i32
    return %c0_i32, %c0_i32_0, %c0_i32_1 : i32, i32, i32
  }
  func.func @transform_3(%arg0: i32) -> (i32, i32, i32) {
    %c0_i32 = arith.constant 0 : i32
    %c0_i32_0 = arith.constant 0 : i32
    %c0_i32_1 = arith.constant 0 : i32
    %c0_i32_2 = arith.constant 0 : i32
    return %c0_i32, %c0_i32_0, %c0_i32_1 : i32, i32, i32
  }
  func.func @transform_4(%arg0: i32) -> (i32, i32) {
    %c0_i32 = arith.constant 0 : i32
    %c0_i32_0 = arith.constant 0 : i32
    %c0_i32_1 = arith.constant 0 : i32
    return %c0_i32, %c0_i32_0 : i32, i32
  }
  func.func @transform_5(%arg0: i32) -> (i32, i32) {
    %c0_i32 = arith.constant 0 : i32
    %c0_i32_0 = arith.constant 0 : i32
    %c0_i32_1 = arith.constant 0 : i32
    return %c0_i32, %c0_i32_0 : i32, i32
  }
  func.func @transform_6(%arg0: i32) -> (i32, i32, i32) {
    %c0_i32 = arith.constant 0 : i32
    %c0_i32_0 = arith.constant 0 : i32
    %c0_i32_1 = arith.constant 0 : i32
    return %arg0, %c0_i32, %c0_i32_0 : i32, i32, i32
  }
}

</mosaic_0001>

<bundles_post_ra>
// kernel: tpu_custom_call.1
= control target key start
LH: loop header
LB: loop body
LE: loop exit
PB: predicated region body
PF: predicated region fallthrough
CT: control target
= control target key end

     0   :  { %s1406_s0 = inlined_call_operand.hbm [shape: f32[2,16,64], index: 0, kind: input, shape index: {}]   ;;  %s1407_s1 = inlined_call_operand.hbm [shape: f32[2,16,64], index: 1, kind: input, shape index: {}]   ;;  %s1408_s2 = inlined_call_operand.hbm [shape: f32[3,64,64], index: 2, kind: input, shape index: {}]   ;;  %s1409_s3 = inlined_call_operand.hbm [shape: f32[3,64,64], index: 3, kind: input, shape index: {}]   ;;  %s1410_s4 = inlined_call_operand.vmem [shape: f32[1,64], index: 4, kind: input, shape index: {}]   ;;  %s1411_s5 = inlined_call_operand.vmem [shape: f32[1,64], index: 5, kind: input, shape index: {}]   ;;  %s1412_s6 = inlined_call_operand.hbm [shape: f32[2,16,64], index: 6, kind: output, shape index: {}]  }
   0x1   :  { %1418 = sst [smem:[#allocation20_spill]] %s1406_s0 }
   0x2   :  { %1419 = sst [smem:[#allocation21_spill]] %s1408_s2 }
   0x3   :  { %1420 = sst [smem:[#allocation22_spill]] %s1409_s3 }
   0x4   :  { %11 = vsyncpa [#allocation5], 0 }
   0x5   :  { %13 = vsyncpa [#allocation5 + $0x1], 0 }
   0x6   :  { %14 = vsyncpa [#allocation8], 0 }
   0x7   :  { %16 = vsyncpa [#allocation8 + $0x1], 0 }
   0x8   :  { %17 = vsyncpa [#allocation11], 0 }
   0x9   :  { %18 = vsyncpa [#allocation6], 0 }
   0xa   :  { %20 = vsyncpa [#allocation6 + $0x1], 0  ;;  %s1173_s21 = smov 0   ;;  %s1175_s22 = smov 0  }
   0xb   :  { %s1177_s23 = smov 0   ;;  %s1179_s24 = smov 0  }
   0xc LB: > { %1421 = sst [smem:[#allocation18_spill]] %s1125_s23  ;;  %s1194_s25 = sadd.s32 4294967295, %s1129_s24   ;;  %s1129_s24 = sphi %s1179_s24, %s1438_s24   ;;  %s1125_s23 = sphi %s1177_s23, %s1435_s23   ;;  %s1121_s22 = sphi %s1175_s22, %s1437_s22   ;;  %s1117_s21 = sphi %s1173_s21, %s1436_s21  }
   0xd   : > { %s789_s26 = sadd.s32 4294967294, %s1129_s24   ;;  %p46_p0 = scmp.ne.s32.totalorder %s1121_s22, %s1117_s21 }
   0xe   : > { %p47_p1 = scmp.eq.s32.totalorder %s1194_s25, 0  ;;  %p180_p2 = scmp.eq.s32.totalorder %s1194_s25, 1 }
   0xf   : > { %p186_p3 = scmp.eq.s32.totalorder %s789_s26, 1  ;;  %p790_p5 = scmp.ge.s32.totalorder %s1129_s24, 1 }
  0x10   : > { %p1203_p4 = por %p47_p1, %p46_p0  ;;  %p193_p7 = scmp.lt.s32.totalorder %s1129_s24, 3 }
  0x11   : > { %p1208_p6 = por %p186_p3, %p46_p0  ;;  %s1424_s2 = sld [smem:[#allocation21_spill]] }
  0x12   : > { %p1216_p8 = pnand %p790_p5, %p193_p7  ;;  %s1131_s9 = smov [#allocation9]  }
  0x13   : > { %s206_s10 = sshll.u32 %s1131_s9, 4  ;;  %s1426_s3 = sld [smem:[#allocation22_spill]]  ;;  %s207_s10 = int_to_ptr.vmem [resolvable:$true] %s206_s10 }
  0x14   : > { %p858_p9 = pneg %p1216_p8  ;;  %s1413_s14 = smov 128  }
  0x15   : > { %s1415_s15 = smov 8   ;;  %s1134_s16 = smov [#allocation10]  }
  0x16   : > { %p859_p10 = pnand %p858_p9, %p47_p1  ;;  %s220_s17 = sshll.u32 %s1134_s16, 4  ;;  %s221_s17 = int_to_ptr.vmem [resolvable:$true] %s220_s17 }
  0x17   : > { %s204_s7 = sshll.u32 %s1424_s2, 4  ;;  %s1235_s18 = sadd.s32 1, %s1129_s24   ;;  %s205_s7 = int_to_ptr.hbm [resolvable:$true] %s204_s7 }
  0x18   : > { %861 = dma.hbm_to_vmem [thread:$0]  (!%p859_p10), %s205_s7, 3072, %s207_s10, [#allocation8], %s1413_s14, %s1413_s14, %s1415_s15  }
  0x19   : > { %s218_s13 = sshll.u32 %s1426_s3, 4  ;;  %s33_s19 = sadd.s32 1, %s1125_s23  ;;  %s219_s13 = int_to_ptr.hbm [resolvable:$true] %s218_s13 }
  0x1a   : > { %864 = dma.hbm_to_vmem [thread:$0]  (!%p859_p10), %s219_s13, 3072, %s221_s17, [#allocation11], %s1413_s14, %s1413_s14, %s1415_s15  }
  0x1b   : > { %s30_s20 = ssub.s32 %s1129_s24, %s1235_s18  ;;  %p40_p12 = scmp.ne.s32.totalorder %s1125_s23, %s1121_s22 }
  0x1c   : > { %p31_p13 = scmp.eq.s32.totalorder %s30_s20, 0  ;;  %p41_p0 = scmp.eq.s32.totalorder %s1129_s24, 0 }
  0x1d   : > { %p1245_p3 = por %p180_p2, %p40_p12  ;;  %p878_p5 = scmp.lt.s32.totalorder %s1129_s24, 2 }
  0x1e   : > { %s1251_s29 = scalar_select %p31_p13, %s1125_s23, %s33_s19  }
  0x1f   : > { %p42_p7 = por %p41_p0, %p40_p12  ;;  %s240_s30 = sand.u32 1, %s1125_s23  }
  0x20   : > { %1428 = sst [smem:[#allocation19_spill]] %s1251_s29  ;;  %s1254_s7 = sshll.u32 %s240_s30, 4 }
  0x21   : > { %s825_s9 = sshll.u32 %s1129_s24, 4  ;;  %s1429_s0 = sld [smem:[#allocation20_spill]] }
  0x22   : > { %s244_s13 = scalar_lea.vmem [#allocation4], %s1254_s7  ;;  %p1261_p2 = pnand %p878_p5, %p42_p7 }
  0x23   : > { %s252_s16 = sshll.u32 %s244_s13, 4  ;;  %s271_s15 = scalar_lea.hbm %s1407_s1, %s825_s9  ;;  %s253_s16 = int_to_ptr.vmem [resolvable:$true] %s252_s16 }
  0x24   : > { %s272_s2 = sshll.u32 %s271_s15, 4  ;;  %s241_s3 = scalar_lea.sflag [#allocation5], %s240_s30  ;;  %s273_s2 = int_to_ptr.hbm [resolvable:$true] %s272_s2 }
  0x25   : > { %p995_p10 = pneg %p1261_p2 }
  0x27   : > { %s249_s12 = scalar_lea.hbm %s1429_s0, %s825_s9  ;;  %s998_s13 = scalar_lea.hbm %s1429_s0, 32 }
  0x28   : > { %s250_s17 = sshll.u32 %s249_s12, 4  ;;  %s251_s17 = int_to_ptr.hbm [resolvable:$true] %s250_s17 }
  0x29   : > { %s991_s29 = sshra.s32 %s251_s17, 4  ;;  %s992_s29 = int_to_ptr.hbm [resolvable:$true] %s991_s29 }
  0x2a   : > { %s993_s10 = scalar_lea.hbm %s992_s29, 16  ;;  %p999_p0 = scmp.lt.s32.totalorder %s992_s29, %s1429_s0 }
  0x2b   : > { %p994_p9 = scmp.ne.s32.totalorder %s992_s29, %s993_s10  ;;  %p1000_p5 = scmp.lt.s32.totalorder %s998_s13, %s993_s10 }
  0x2d   : > { %p996_p12 = pnand %p995_p10, %p994_p9  ;;  %p1001_p7 = por %p1000_p5, %p999_p0 }
  0x2f   : > { %p997_p13 = pneg %p996_p12 }
  0x31   : > { %p1002_p11 = pnand %p1001_p7, %p997_p13 }
  0x33   : > { %1005 = shalt.err (!%p1002_p11)
}
  0x34   : > { %s1431_s15 = smov 8   ;;  %s1432_s30 = smov 128  }
  0x35   : > { %868 = dma.hbm_to_vmem [thread:$0]  (!%p1261_p2), %s251_s17, 256, %s253_s16, %s241_s3, %s1432_s30, %s1432_s30, %s1431_s15  }
  0x36   : > { %s266_s9 = scalar_lea.vmem [#allocation7], %s1254_s7  ;;  %s262_s12 = sand.u32 1, %s1129_s24  }
  0x37   : > { %s274_s11 = sshll.u32 %s266_s9, 4  ;;  %s263_s14 = scalar_lea.sflag [#allocation8], %s262_s12  ;;  %s275_s11 = int_to_ptr.vmem [resolvable:$true] %s274_s11 }
  0x38   : > { %s1021_s29 = sshra.s32 %s273_s2, 4  ;;  %s1028_s0 = scalar_lea.hbm %s1407_s1, 32  ;;  %s1022_s29 = int_to_ptr.hbm [resolvable:$true] %s1021_s29 }
  0x39   : > { %s1023_s10 = scalar_lea.hbm %s1022_s29, 16  ;;  %p1029_p13 = scmp.lt.s32.totalorder %s1022_s29, %s1407_s1 }
  0x3a   : > { %p1024_p9 = scmp.ne.s32.totalorder %s1022_s29, %s1023_s10  ;;  %p1030_p0 = scmp.lt.s32.totalorder %s1028_s0, %s1023_s10 }
  0x3c   : > { %p1026_p11 = pnand %p1024_p9, %p995_p10  ;;  %p1031_p5 = por %p1030_p0, %p1029_p13 }
  0x3e   : > { %p1027_p12 = pneg %p1026_p11 }
  0x40   : > { %p1032_p7 = pnand %p1031_p5, %p1027_p12 }
  0x42   : > { %1035 = shalt.err (!%p1032_p7)
}
  0x43   : > { %871 = dma.hbm_to_vmem [thread:$0]  (!%p1261_p2), %s273_s2, 256, %s275_s11, %s263_s14, %s1432_s30, %s1432_s30, %s1431_s15  }
  0x44   : > { %286 = sbr.rel (%p1216_p8) target bundleno = 292 (0x124), region = 44  ;;  %s1303_s7 = sand.u32 (!%p1216_p8), 1, %s1121_s22  }
  0x45   : > { %s1306_s23 = sshll.u32 (!%p1216_p8), %s1303_s7, 4  ;;  %s289_s0 = scalar_lea.sflag (!%p1216_p8), [#allocation5], %s1303_s7 }
  0x46   : > { %s292_s16 = scalar_lea.vmem (!%p1216_p8), [#allocation4], %s1306_s23 }
  0x49   : > { %1096 = dma.done.wait (%p1203_p4), %s289_s0, 256  }
  0x4a   : > { %1098 = vsyncadd (%p1203_p4), %s289_s0, 4294967040  ;;  %s298_s2 = sand.u32 1, %s1194_s25   ;;  %s302_s17 = scalar_lea.vmem [#allocation7], %s1306_s23 }
  0x4b   : > { %s299_s8 = scalar_lea.sflag [#allocation8], %s298_s2 }
  0x4c   : > { %1100 = dma.done.wait (%p1203_p4), %s299_s8, 256  }
  0x4d   : > { %1102 = vsyncadd (%p1203_p4), %s299_s8, 4294967040 }
  0x4e   : > { %1104 = dma.done.wait (%p47_p1), [#allocation8], 3072  }
  0x4f   : > { %1106 = vsyncadd (%p47_p1), [#allocation8], 4294964224 }
  0x50   : > { %1108 = dma.done.wait (%p47_p1), [#allocation11], 3072  }
  0x51   : > { %1110 = vsyncadd (%p47_p1), [#allocation11], 4294964224  ;;  %vm351_vm0 = vcmask 523264   ;;  %v1135_v0 = vmov 0.0   ;;  %v392_v1 = vld [vmem:[#allocation9 + $0x78] sm:$0xff]  ;;  %v391_v5 = vld [vmem:[#allocation9 + $0x70] sm:$0xff] }
  0x52   : > { %352 = vst.msk [vmem:[#allocation2] sm:$0xff] %vm351_vm0, %v1135_v0  ;;  %v371_v2 = vld [vmem:[#allocation9 + $0x38] sm:$0xff]  ;;  %407 = vmatpush.msra.mxu0 %v392_v1  ;;  %v370_v6 = vld [vmem:[#allocation9 + $0x30] sm:$0xff]  ;;  %v390_v9 = vld [vmem:[#allocation9 + $0x68] sm:$0xff]  ;;  %s827_s9 = sshll.u32 %s1194_s25, 4  ;;  %s346_s25 = scalar_lea.vmem [#allocation12], %s1306_s23 }
  0x53   : > { %353 = vst.msk [vmem:[#allocation2 + $0x18] sm:$0xff] %vm351_vm0, %v1135_v0  ;;  %v459_v3 = vld [vmem:[#allocation10 + $0x78] sm:$0xff]  ;;  %436 = vmatpush.msra.mxu1 %v371_v2  ;;  %v458_v7 = vld [vmem:[#allocation10 + $0x70] sm:$0xff]  ;;  %v369_v10 = vld [vmem:[#allocation9 + $0x28] sm:$0xff]  ;;  %s670_s14 = scalar_lea.hbm %s1412_s6, %s827_s9  ;;  %s671_s29 = sshll.u32 %s346_s25, 4  ;;  %s672_s29 = int_to_ptr.vmem [resolvable:$true] %s671_s29 }
  0x54   : > { %354 = vst.msk [vmem:[#allocation3] sm:$0xff] %vm351_vm0, %v1135_v0  ;;  %v379_v4 = vld [vmem:[#allocation10 + $0x38] sm:$0xff]  ;;  %474 = vmatpush.msra.mxu2 %v459_v3  ;;  %v378_v8 = vld [vmem:[#allocation10 + $0x30] sm:$0xff]  ;;  %408 = vmatpush.msra.mxu0 %v391_v5  ;;  %v457_v11 = vld [vmem:[#allocation10 + $0x68] sm:$0xff]  ;;  %s673_s10 = sshll.u32 %s670_s14, 4  ;;  %s659_s13 = scalar_lea.sflag [#allocation6], %s1303_s7  ;;  %s674_s10 = int_to_ptr.hbm [resolvable:$true] %s673_s10 }
  0x55   : > { %355 = vst.msk [vmem:[#allocation3 + $0x18] sm:$0xff] %vm351_vm0, %v1135_v0  ;;  %503 = vmatpush.msra.mxu3 %v379_v4  ;;  %437 = vmatpush.msra.mxu1 %v370_v6  ;;  %v377_v12 = vld [vmem:[#allocation10 + $0x28] sm:$0xff]  ;;  %v389_v13 = vld [vmem:[#allocation9 + $0x60] sm:$0xff]  ;;  %v388_v17 = vld [vmem:[#allocation9 + $0x58] sm:$0xff]  ;;  %s1065_s19 = sshra.s32 %s674_s10, 4  ;;  %s1066_s19 = int_to_ptr.hbm [resolvable:$true] %s1065_s19 }
  0x56   : > { %475 = vmatpush.msra.mxu2 %v458_v7  ;;  %v368_v14 = vld [vmem:[#allocation9 + $0x20] sm:$0xff]  ;;  %409 = vmatpush.msra.mxu0 %v390_v9  ;;  %v367_v18 = vld [vmem:[#allocation9 + $0x18] sm:$0xff]  ;;  %v387_v21 = vld [vmem:[#allocation9 + $0x50] sm:$0xff]  ;;  %s1067_s3 = scalar_lea.hbm %s1066_s19, 16  ;;  %p1072_p2 = scmp.lt.s32.totalorder %s1066_s19, %s1412_s6 }
  0x57   : > { %504 = vmatpush.msra.mxu3 %v378_v8  ;;  %438 = vmatpush.msra.mxu1 %v369_v10  ;;  %v456_v15 = vld [vmem:[#allocation10 + $0x60] sm:$0xff]  ;;  %v455_v19 = vld [vmem:[#allocation10 + $0x58] sm:$0xff]  ;;  %v366_v22 = vld [vmem:[#allocation9 + $0x10] sm:$0xff]  ;;  %p1068_p1 = scmp.ne.s32.totalorder %s1066_s19, %s1067_s3 }
  0x58   : > { %v376_v16 = vld [vmem:[#allocation10 + $0x20] sm:$0xff]  ;;  %476 = vmatpush.msra.mxu2 %v457_v11  ;;  %410 = vmatpush.msra.mxu0 %v389_v13  ;;  %v375_v20 = vld [vmem:[#allocation10 + $0x18] sm:$0xff]  ;;  %v454_v23 = vld [vmem:[#allocation10 + $0x50] sm:$0xff] }
  0x59   : > { %505 = vmatpush.msra.mxu3 %v377_v12  ;;  %439 = vmatpush.msra.mxu1 %v368_v14  ;;  %v374_v24 = vld [vmem:[#allocation10 + $0x10] sm:$0xff]  ;;  %v386_v25 = vld [vmem:[#allocation9 + $0x48] sm:$0xff]  ;;  %v385_v31 = vld [vmem:[#allocation9 + $0x40] sm:$0xff]  ;;  %p1069_p4 = pnand %p1068_p1, %p1245_p3 }
  0x5a   : > { %477 = vmatpush.msra.mxu2 %v456_v15  ;;  %411 = vmatpush.msra.mxu0 %v388_v17  ;;  %v365_v26 = vld [vmem:[#allocation9 + $0x8] sm:$0xff]  ;;  %v1334_v27 = vld [vmem:[%s292_s16] sm:$0xff]  ;;  %v570_v35 = vld [vmem:[#allocation10 + $0xb8] sm:$0xff] }
  0x5b   : > { %506 = vmatpush.msra.mxu3 %v376_v16  ;;  %440 = vmatpush.msra.mxu1 %v367_v18  ;;  %v453_v28 = vld [vmem:[#allocation10 + $0x48] sm:$0xff]  ;;  %356 = vst.msk [vmem:[#allocation2 + $0x8] sm:$0xff] %vm351_vm0, %v1334_v27  ;;  %v349_v30 = vld [vmem:[%s302_s17] sm:$0xff]  ;;  %v530_v36 = vld [vmem:[#allocation9 + $0xb8] sm:$0xff]  ;;  %p1070_p8 = pneg %p1069_p4 }
  0x5c   : > { %478 = vmatpush.msra.mxu2 %v455_v19  ;;  %412 = vmatpush.msra.mxu0 %v387_v21  ;;  %v373_v29 = vld [vmem:[#allocation10 + $0x8] sm:$0xff]  ;;  %v364_v32 = vld [vmem:[#allocation9] sm:$0xff]  ;;  %358 = vst.msk [vmem:[#allocation3 + $0x8] sm:$0xff] %vm351_vm0, %v349_v30  ;;  %v569_v39 = vld [vmem:[#allocation10 + $0xb0] sm:$0xff] }
  0x5d   : > { %507 = vmatpush.msra.mxu3 %v375_v20  ;;  %441 = vmatpush.msra.mxu1 %v366_v22  ;;  %v452_v33 = vld [vmem:[#allocation10 + $0x40] sm:$0xff]  ;;  %v1343_v37 = vld [vmem:[%s292_s16 + $0x8] sm:$0xff]  ;;  %v529_v42 = vld [vmem:[#allocation9 + $0xb0] sm:$0xff]  ;;  %s1071_s16 = scalar_lea.hbm %s1412_s6, 32 }
  0x5e   : > { %479 = vmatpush.msra.mxu2 %v454_v23  ;;  %413 = vmatpush.msra.mxu0 %v386_v25  ;;  %v372_v34 = vld [vmem:[#allocation10] sm:$0xff]  ;;  %v350_v38 = vld [vmem:[%s302_s17 + $0x8] sm:$0xff]  ;;  %357 = vst.msk [vmem:[#allocation2 + $0x10] sm:$0xff] %vm351_vm0, %v1343_v37  ;;  %v565_v55 = vld [vmem:[#allocation10 + $0x90] sm:$0xff]  ;;  %p1073_p10 = scmp.lt.s32.totalorder %s1071_s16, %s1067_s3 }
  0x5f   : > { %508 = vmatpush.msra.mxu3 %v374_v24  ;;  %442 = vmatpush.msra.mxu1 %v365_v26  ;;  %359 = vst.msk [vmem:[#allocation3 + $0x10] sm:$0xff] %vm351_vm0, %v350_v38  ;;  %v568_v45 = vld [vmem:[#allocation10 + $0xa8] sm:$0xff]  ;;  %v567_v47 = vld [vmem:[#allocation10 + $0xa0] sm:$0xff]  ;;  %v566_v53 = vld [vmem:[#allocation10 + $0x98] sm:$0xff] }
  0x60   : > { %480 = vmatpush.msra.mxu2 %v453_v28  ;;  %414 = vmatpush.msra.mxu0 %v385_v31  ;;  %v528_v46 = vld [vmem:[#allocation9 + $0xa8] sm:$0xff]  ;;  %v527_v48 = vld [vmem:[#allocation9 + $0xa0] sm:$0xff]  ;;  %v526_v54 = vld [vmem:[#allocation9 + $0x98] sm:$0xff]  ;;  %p1074_p9 = por %p1073_p10, %p1072_p2 }
  0x61   : > { %509 = vmatpush.msra.mxu3 %v373_v29  ;;  %443 = vmatpush.msra.mxu1 %v364_v32  ;;  %v525_v56 = vld [vmem:[#allocation9 + $0x90] sm:$0xff]  ;;  %v564_v57 = vld [vmem:[#allocation10 + $0x88] sm:$0xff]  ;;  %v563_v59 = vld [vmem:[#allocation10 + $0x80] sm:$0xff] }
  0x62   : > { %481 = vmatpush.msra.mxu2 %v452_v33  ;;  %545 = vmatpush.msrb.mxu0 %v530_v36  ;;  %v380_v40 = vld [vmem:[#allocation2 + $0x8] sm:$0xff]  ;;  %v523_v60 = vld [vmem:[#allocation9 + $0x80] sm:$0xff]  ;;  %p1075_p11 = pnand %p1074_p9, %p1070_p8 }
  0x63   : > { %510 = vmatpush.msra.mxu3 %v372_v34  ;;  %v360_v41 = vld [vmem:[#allocation2 + $0x7] sm:$0xff]  ;;  %585 = vmatpush.msrb.mxu1 %v570_v35  ;;  %v922_v7 = vld [vmem:[%s1411_s5] ss:$0 sm:$0xff] }
  0x64   : > { %828 = vmatpush.msrb.mxu2 %v530_v36  ;;  %806 = vmatmul.msk.f32.vlgmr.msra.gmra.mxu0 %vm351_vm0, %v380_v40  ;;  %v382_v43 = vld [vmem:[#allocation3 + $0x8] sm:$0xff]  ;;  %v921_v32 = vld [vmem:[%s1410_s4] ss:$0 sm:$0xff] }
  0x65   : > { %836 = vmatpush.msrb.mxu3 %v570_v35  ;;  %808 = vmatmul.msk.f32.vlgmr.msra.gmra.mxu1 %vm351_vm0, %v360_v41  ;;  %v362_v44 = vld [vmem:[#allocation3 + $0x7] sm:$0xff]  ;;  %v381_v49 = vld [vmem:[#allocation2 + $0x10] sm:$0xff] }
  0x66   : > { %810 = vmatmul.msk.f32.vlgmr.msra.gmra.mxu2 %vm351_vm0, %v382_v43  ;;  %812 = vmatmul.msk.f32.vlgmr.msra.gmra.mxu3 %vm351_vm0, %v362_v44  ;;  %v361_v50 = vld [vmem:[#allocation2 + $0xf] sm:$0xff] }
  0x67   : > { %837 = vmatpush.msrb.mxu3 %v569_v39  ;;  %546 = vmatpush.msrb.mxu0 %v529_v42  ;;  %v383_v51 = vld [vmem:[#allocation3 + $0x10] sm:$0xff]  ;;  %v524_v58 = vld [vmem:[#allocation9 + $0x88] sm:$0xff] }
  0x68   : > { %829 = vmatpush.msrb.mxu2 %v529_v42  ;;  %586 = vmatpush.msrb.mxu1 %v569_v39  ;;  %v363_v52 = vld [vmem:[#allocation3 + $0xf] sm:$0xff] }
  0x69   : > { %838 = vmatpush.msrb.mxu3 %v568_v45  ;;  %547 = vmatpush.msrb.mxu0 %v528_v46  ;;  %v518_v61 = vld [vmem:[#allocation2 + $0x9] sm:$0xff]  ;;  %v519_v62 = vld [vmem:[#allocation2 + $0x11] sm:$0xff] }
  0x6a   : > { %830 = vmatpush.msrb.mxu2 %v528_v46  ;;  %587 = vmatpush.msrb.mxu1 %v568_v45  ;;  %v520_v63 = vld [vmem:[#allocation3 + $0x9] sm:$0xff]  ;;  %v521_v0 = vld [vmem:[#allocation3 + $0x11] sm:$0xff] }
  0x6b   : > { %839 = vmatpush.msrb.mxu3 %v567_v47  ;;  %548 = vmatpush.msrb.mxu0 %v527_v48 }
  0x6c   : > { %831 = vmatpush.msrb.mxu2 %v527_v48  ;;  %588 = vmatpush.msrb.mxu1 %v567_v47 }
  0x6d   : > { %807 = vmatmul.msk.f32.gmra.mxu0 %vm351_vm0, %v381_v49  ;;  %809 = vmatmul.msk.f32.gmra.mxu1 %vm351_vm0, %v361_v50 }
  0x6e   : > { %811 = vmatmul.msk.f32.gmra.mxu2 %vm351_vm0, %v383_v51  ;;  %813 = vmatmul.msk.f32.gmra.mxu3 %vm351_vm0, %v363_v52 }
  0x6f   : > { %840 = vmatpush.msrb.mxu3 %v566_v53  ;;  %549 = vmatpush.msrb.mxu0 %v526_v54 }
  0x70   : > { %832 = vmatpush.msrb.mxu2 %v526_v54  ;;  %589 = vmatpush.msrb.mxu1 %v566_v53 }
  0x71   : > { %841 = vmatpush.msrb.mxu3 %v565_v55  ;;  %550 = vmatpush.msrb.mxu0 %v525_v56 }
  0x72   : > { %833 = vmatpush.msrb.mxu2 %v525_v56  ;;  %590 = vmatpush.msrb.mxu1 %v565_v55 }
  0x73   : > { %842 = vmatpush.msrb.mxu3 %v564_v57  ;;  %551 = vmatpush.msrb.mxu0 %v524_v58 }
  0x74   : > { %834 = vmatpush.msrb.mxu2 %v524_v58  ;;  %591 = vmatpush.msrb.mxu1 %v564_v57 }
  0x75   : > { %843 = vmatpush.msrb.mxu3 %v563_v59  ;;  %552 = vmatpush.msrb.mxu0 %v523_v60 }
  0x76   : > { %835 = vmatpush.msrb.mxu2 %v523_v60  ;;  %592 = vmatpush.msrb.mxu1 %v563_v59 }
  0x77   : > { %814 = vmatmul.msk.f32.vlgmr.msrb.gmra.mxu0 %vm351_vm0, %v518_v61  ;;  %815 = vmatmul.msk.f32.vlgmr.msrb.gmra.mxu2 %vm351_vm0, %v519_v62 }
  0x78   : > { %816 = vmatmul.msk.f32.vlgmr.msrb.gmra.mxu1 %vm351_vm0, %v520_v63  ;;  %817 = vmatmul.msk.f32.vlgmr.msrb.gmra.mxu3 %vm351_vm0, %v521_v0 }
  0xe1   : > { %v416_v12 = vpop.f32.mrf.mxu0 }
  0xe2   : > { %v445_v1 = vpop.f32.mrf.mxu1 }
  0xe3   : > { %v446_v28 = vadd.f32 %v445_v1, %v416_v12 }
  0xe9   : > { %v512_v2 = vpop.f32.mrf.mxu3  ;;  %v483_v4 = vpop.f32.mrf.mxu2 }
  0xea   : > { %v448_v3 = vpop.f32.mrf.mxu1  ;;  %v513_v6 = vadd.f32 %v512_v2, %v483_v4  ;;  %v419_v20 = vpop.f32.mrf.mxu0 }
  0xeb   : > { %v449_v40 = vadd.f32 %v448_v3, %v419_v20 }
  0xf1   : > { %v515_v5 = vpop.f32.mrf.mxu3  ;;  %v486_v10 = vpop.f32.mrf.mxu2 }
  0xf2   : > { %v516_v13 = vadd.f32 %v515_v5, %v486_v10 }
  0xf4   : > { %v554_v26 = vpop.f32.mrf.mxu0 }
  0xf5   : > { %v594_v8 = vpop.f32.mrf.mxu1  ;;  %v560_v31 = vadd.f32 %v554_v26, %v446_v28 }
  0xf6   : > { %v600_v9 = vadd.f32 %v594_v8, %v513_v6 }
  0xf7   : > { %v606_v42 = vadd.f32 %v921_v32, %v560_v31 }
  0xf8   : > { %v612_v11 = vadd.f32 %v922_v7, %v600_v9 }
  0xfa   : > { %v818_v14 = vmul.f32 -1.442695, %v612_v11  ;;  %v557_v38 = vpop.f32.mrf.mxu2 }
  0xfb   : > { %v597_v15 = vpop.f32.mrf.mxu3  ;;  %v561_v46 = vadd.f32 %v557_v38, %v449_v40 }
  0xfc   : > { %923 = vpow2.f32 %v818_v14  ;;  %v601_v16 = vadd.f32 %v597_v15, %v516_v13 }
  0xfd   : > { %v607_v54 = vadd.f32 %v921_v32, %v561_v46 }
  0xfe   : > { %v613_v17 = vadd.f32 %v922_v7, %v601_v16 }
 0x100   : > { %v819_v18 = vmul.f32 -1.442695, %v613_v17 }
 0x102   : > { %v924_v19 = vpop.eup %923  ;;  %925 = vpow2.f32 %v819_v18 }
 0x103   : > { %v620_v21 = vadd.f32 1.0, %v924_v19 }
 0x105   : > { %927 = vrcp.f32 %v620_v21  ;;  %v633_v30 = vand.u32 2147483648, %v620_v21  ;;  %v631_v34 = vand.u32 2147483647, %v620_v21  ;;  %vm627_vm2 = vweird.f32 %v620_v21 }
 0x107   : > { %v634_v41 = vor.u32 1.1754944e-38, %v633_v30  ;;  %vm632_vm4 = vcmp.eq.f32.partialorder %v631_v34, 8.507059e+37 }
 0x108   : > { %v926_v22 = vpop.eup %925 }
 0x109   : > { %v621_v23 = vadd.f32 1.0, %v926_v22 }
 0x10b   : > { %v928_v24 = vpop.eup %927  ;;  %929 = vrcp.f32 %v621_v23  ;;  %v648_v47 = vand.u32 2147483648, %v621_v23  ;;  %v646_v50 = vand.u32 2147483647, %v621_v23  ;;  %vm642_vm6 = vweird.f32 %v621_v23 }
 0x10c   : > { %v623_v25 = vmul.f32 %v928_v24, %v620_v21  ;;  %vm628_vm1 = vweird.f32 %v928_v24 }
 0x10d   : > { %vm629_vm3 = vmor %vm627_vm2, %vm628_vm1  ;;  %v649_v53 = vor.u32 1.1754944e-38, %v648_v47  ;;  %vm647_vm8 = vcmp.eq.f32.partialorder %v646_v50, 8.507059e+37 }
 0x10e   : > { %v624_v29 = vsub.f32 1.0, %v623_v25 }
 0x110   : > { %v625_v33 = vmul.f32 %v928_v24, %v624_v29 }
 0x111   : > { %v930_v35 = vpop.eup %929 }
 0x112   : > { %v626_v36 = vadd.f32 %v928_v24, %v625_v33  ;;  %v638_v39 = vmul.f32 %v930_v35, %v621_v23  ;;  %vm643_vm5 = vweird.f32 %v930_v35 }
 0x113   : > { %vm644_vm7 = vmor %vm642_vm6, %vm643_vm5 }
 0x114   : > { %v630_v43 = vsel %vm629_vm3, %v928_v24, %v626_v36  ;;  %v639_v44 = vsub.f32 1.0, %v638_v39 }
 0x115   : > { %v635_v45 = vsel %vm632_vm4, %v634_v41, %v630_v43 }
 0x116   : > { %v652_v48 = vmul.f32 %v635_v45, %v606_v42  ;;  %v640_v49 = vmul.f32 %v930_v35, %v639_v44 }
 0x118   : > { %v641_v51 = vadd.f32 %v930_v35, %v640_v49  ;;  %v654_v52 = vadd.f32 %v652_v48, %v1334_v27 }
 0x11a   : > { %v645_v55 = vsel %vm644_vm7, %v930_v35, %v641_v51  ;;  %656 = vst.msk [vmem:[%s346_s25] sm:$0xff] %vm351_vm0, %v654_v52 }
 0x11b   : > { %v650_v56 = vsel %vm647_vm8, %v649_v53, %v645_v55 }
 0x11c   : > { %v653_v57 = vmul.f32 %v650_v56, %v607_v54 }
 0x11e   : > { %v655_v58 = vadd.f32 %v653_v57, %v1343_v37 }
 0x120   : > { %657 = vst.msk [vmem:[%s346_s25 + $0x8] sm:$0xff] %vm351_vm0, %v655_v58 }
 0x121   : > { %1078 = shalt.err (!%p1075_p11)
}
 0x122   : > { %s1136_s7 = smov 128   ;;  %s1137_s17 = smov 8  }
 0x123   : > { %856 = dma.vmem_to_hbm [thread:$0]  (%p1245_p3), %s672_s29, 256, %s674_s10, %s659_s13, %s1136_s7, %s1136_s7, %s1137_s17  }
 0x124 PF: > { %s688_s27 = sand.u32 1, %s1117_s21   ;;  %p1433_p12 = scmp.ge.s32.totalorder %s1129_s24, 2 }
 0x125   : > { %s689_s20 = scalar_lea.sflag [#allocation6], %s688_s27 }
 0x126   : > { %p873_p13 = pnand %p1433_p12, %p1208_p6 }
 0x128   : > { %p874_p0 = pneg %p873_p13 }
 0x12a   : > { %1112 = dma.done.wait (%p874_p0), %s689_s20, 256  }
 0x12b   : > { %1114 = vsyncadd (%p874_p0), %s689_s20, 4294967040  ;;  %s1434_s15 = sld [smem:[#allocation18_spill]]  ;;  %p23_p5 = scmp.ge.s32.totalorder %s1235_s18, 4  }
 0x12c   : > { %s1435_s23 = sld [smem:[#allocation19_spill]]  ;;  %s1436_s21 = smov %s1121_s22 }
 0x12d   : > { %s1438_s24 = smov %s1235_s18  ;;  %25 = sbr.rel (!%p23_p5) target bundleno = 12 (0xc), region = 114 }
 0x131   : > { %s1437_s22 = smov %s1434_s15 }
 0x132   :  { %695 = vsyncpa [#allocation5], 1 }
 0x133   :  { %697 = vsyncpa [#allocation5 + $0x1], 1 }
 0x134   :  { %698 = vsyncpa [#allocation8], 1 }
 0x135   :  { %700 = vsyncpa [#allocation8 + $0x1], 1 }
 0x136   :  { %701 = vsyncpa [#allocation11], 1 }
 0x137   :  { %702 = vsyncpa [#allocation6], 1 }
 0x138   :  { %704 = vsyncpa [#allocation6 + $0x1], 1 }

</bundles_post_ra>
